<compile_context>
chip_gen: v7x
topology: tpu7x:2x2x1
jax: 0.10.0
libtpu: 0.0.40
codegen_flags: <defaults>
</compile_context>

<pallas_src>
import functools

import jax
import jax.numpy as jnp
from jax import lax
from jax.experimental import pallas as pl
from jax.experimental.pallas import tpu as pltpu

_EPS = 1e-8


def _koleo_kernel(x_ref, invr_ref, invc_ref, bias_ref, o_ref, *,
                  block_q, batch, batch_pad):
    qi = pl.program_id(0)
    row0 = pl.multiple_of(qi * block_q, block_q)

    # Keys stay resident in VMEM in the original dtype; the query tile is a
    # row-slice of the same buffer (x is only DMA'd once from HBM).
    keys = x_ref[...]                           # (Bp, Dp), input dtype
    q = x_ref[pl.ds(row0, block_q), :]          # (TQ, Dp), input dtype

    # Gram tile (TQ, Bp): contract the feature dim directly; MXU runs in the
    # input dtype with an f32 accumulator.
    dots = lax.dot_general(
        q, keys,
        dimension_numbers=(((1,), (1,)), ((), ())),
        preferred_element_type=jnp.float32,
    )

    # F.normalize folded onto the Gram values: cos(i,j) = (x_i.x_j)*inv_i*inv_j.
    dots = dots * invr_ref[...] * invc_ref[...]

    if batch_pad != batch:
        # Padded key rows are exact zeros -> their dots are exactly 0; the
        # precomputed bias turns them into exactly -1 (same as torch's fill).
        dots = dots + bias_ref[...]

    # Diagonal -> -1 (torch's dots.view(-1)[::n+1].fill_(-1)).
    row_g = row0 + lax.broadcasted_iota(jnp.int32, (block_q, 1), 0)   # (TQ, 1)
    col_g = lax.broadcasted_iota(jnp.int32, (block_q, batch_pad), 1)  # (TQ, Bp)
    dots = jnp.where(col_g == row_g, jnp.float32(-1.0), dots)

    # Nearest-neighbor distance via the unit-norm identity.
    mx = jnp.max(dots, axis=1, keepdims=True)                         # (TQ, 1)
    dist = jnp.sqrt(jnp.maximum(2.0 - 2.0 * mx, 0.0))
    logd = jnp.log(dist + _EPS)
    if batch_pad != batch:
        logd = jnp.where(row_g < batch, logd, 0.0)                    # drop padded rows

    o_ref[...] = jnp.full(o_ref.shape, jnp.sum(logd), dtype=jnp.float32)


def koleo_loss(student_output, *, block_q=256):
    """KoLeo loss: -mean(log(||x_i - x_nn(i)||_2 + eps)) over L2-normalized rows."""
    B, D = student_output.shape

    # Hardware-friendly padding: lanes (D) -> multiple of 128; query tile 256
    # (MXU-filling on v6e/v7x) or the smallest sublane multiple covering B.
    d_pad = pl.cdiv(D, 128) * 128
    tq = block_q if B >= block_q else pl.cdiv(B, 8) * 8
    b_pad = pl.cdiv(B, tq) * tq

    # Hoisted inverse L2 norms (F.normalize denominator), computed once in f32.
    x = student_output                          # keep original dtype for the MXU
    sumsq = jnp.sum(jnp.square(x.astype(jnp.float32)), axis=-1)        # (B,)
    inv = lax.rsqrt(jnp.maximum(sumsq, jnp.float32(_EPS * _EPS)))      # (B,)
    if b_pad != B:
        inv = jnp.pad(inv, (0, b_pad - B))      # padded rows -> inv = 0
    inv_row = inv.reshape(b_pad, 1)
    inv_col = inv.reshape(1, b_pad)
    pad_bias = jnp.where(jnp.arange(b_pad) < B, 0.0, -1.0).astype(jnp.float32)
    pad_bias = pad_bias.reshape(1, b_pad)

    if (b_pad, d_pad) != (B, D):
        x = jnp.pad(x, ((0, b_pad - B), (0, d_pad - D)))

    num_q_tiles = b_pad // tq
    kernel = functools.partial(_koleo_kernel, block_q=tq, batch=B, batch_pad=b_pad)

    # Generation-aware VMEM budget (~80% of per-core capacity).
    try:
        vmem_cap = pltpu.get_tpu_info().vmem_capacity_bytes
    except Exception:
        vmem_cap = 64 * 1024 * 1024
    vmem_limit = min(int(vmem_cap * 0.8), 112 * 1024 * 1024)

    out = pl.pallas_call(
        kernel,
        out_shape=jax.ShapeDtypeStruct((num_q_tiles, 8, 128), jnp.float32),
        grid=(num_q_tiles,),
        in_specs=[
            pl.BlockSpec((b_pad, d_pad), lambda qi: (0, 0)),   # keys (+queries), resident
            pl.BlockSpec((tq, 1), lambda qi: (qi, 0)),         # per-tile row inverse norms
            pl.BlockSpec((1, b_pad), lambda qi: (0, 0)),       # column inverse norms
            pl.BlockSpec((1, b_pad), lambda qi: (0, 0)),       # padded-column bias
        ],
        out_specs=pl.BlockSpec((1, 8, 128), lambda qi: (qi, 0, 0)),
        compiler_params=pltpu.CompilerParams(
            dimension_semantics=("parallel",),
            vmem_limit_bytes=vmem_limit,
        ),
    )(x, inv_row, inv_col, pad_bias)

    return -jnp.sum(out[:, 0, 0]) / jnp.float32(B)


def _koleo_loss_ref(x, eps=_EPS):
    """Pure-JAX mirror of the PyTorch module (argmax gather + eps inside the norm)."""
    x = x.astype(jnp.float32)
    norm = jnp.sqrt(jnp.sum(x * x, axis=-1, keepdims=True))
    x = x / jnp.maximum(norm, eps)
    dots = x @ x.T
    n = x.shape[0]
    dots = dots.at[jnp.arange(n), jnp.arange(n)].set(-1.0)
    nn_idx = jnp.argmax(dots, axis=1)
    diff = x - x[nn_idx] + eps              # nn.PairwiseDistance adds eps elementwise
    dist = jnp.sqrt(jnp.sum(diff * diff, axis=-1))
    return -jnp.mean(jnp.log(dist + eps))


if __name__ == "__main__":
    key = jax.random.PRNGKey(0)
    B, D = 8, 32
    student_output = jax.random.normal(key, (B, D), dtype=jnp.float32)

    loss = koleo_loss(student_output)
    jax.block_until_ready(loss)

    ref = _koleo_loss_ref(student_output)
    assert jnp.allclose(loss, ref, rtol=1e-5, atol=1e-5), (loss, ref)

    print("KERNEL_OK")
</pallas_src>

<mosaic_0001>
module attributes {stable_mosaic.version = 11 : i64} {
  func.func @_koleo_kernel(%arg0: i32, %arg1: memref<8x128xf32, #tpu.memory_space<vmem>>, %arg2: memref<8x1xf32, #tpu.memory_space<vmem>>, %arg3: memref<1x8xf32, #tpu.memory_space<vmem>>, %arg4: memref<1x8xf32, #tpu.memory_space<vmem>>, %arg5: memref<1x8x128xf32, #tpu.memory_space<vmem>>) attributes {dimension_semantics = [#tpu.dimension_semantics<parallel>], iteration_bounds = array<i64: 1>, scalar_prefetch = 0 : i64, scratch_operands = 0 : i64, tpu.core_type = #tpu.core_type<tc>, window_params = [{pipeline_mode = #tpu.pipeline_mode<synchronous>, transform_indices = @transform_0, window_bounds = array<i64: 8, 128>}, {transform_indices = @transform_1, window_bounds = array<i64: 8, 1>}, {pipeline_mode = #tpu.pipeline_mode<synchronous>, transform_indices = @transform_2, window_bounds = array<i64: 1, 8>}, {pipeline_mode = #tpu.pipeline_mode<synchronous>, transform_indices = @transform_3, window_bounds = array<i64: 1, 8>}, {transform_indices = @transform_4, window_bounds = array<i64: 1, 8, 128>}]} {
    %c8_i32 = arith.constant 8 : i32
    %0 = arith.muli %arg0, %c8_i32 : i32
    %1 = tpu.assume_multiple %0, 8 : i32
    %c0 = arith.constant 0 : index
    %c0_0 = arith.constant 0 : index
    %2 = vector.load %arg1[%c0, %c0_0] : memref<8x128xf32, #tpu.memory_space<vmem>>, vector<8x128xf32>
    %3 = arith.index_cast %1 : i32 to index
    %c0_1 = arith.constant 0 : index
    %4 = vector.load %arg1[%3, %c0_1] : memref<8x128xf32, #tpu.memory_space<vmem>>, vector<8x128xf32>
    %cst = arith.constant dense<0.000000e+00> : vector<8x8xf32>
    %5 = tpu.matmul %4, %2, %cst {dimension_numbers = #tpu.dot_dimension_numbers<[1], [1], [0], [0], [0, 0, 1, 0], [], []>} : vector<8x128xf32>, vector<8x128xf32>, vector<8x8xf32> -> vector<8x8xf32>
    %c0_2 = arith.constant 0 : index
    %c0_3 = arith.constant 0 : index
    %6 = vector.load %arg2[%c0_2, %c0_3] : memref<8x1xf32, #tpu.memory_space<vmem>>, vector<8x1xf32>
    %7 = vector.broadcast %6 : vector<8x1xf32> to vector<8x8xf32>
    %8 = arith.mulf %5, %7 : vector<8x8xf32>
    %c0_4 = arith.constant 0 : index
    %c0_5 = arith.constant 0 : index
    %9 = vector.load %arg3[%c0_4, %c0_5] : memref<1x8xf32, #tpu.memory_space<vmem>>, vector<1x8xf32>
    %10 = vector.broadcast %9 : vector<1x8xf32> to vector<8x8xf32>
    %11 = arith.mulf %8, %10 : vector<8x8xf32>
    %12 = tpu.iota {dimensions = array<i32: 0>} : vector<8x1xi32>
    %13 = vector.broadcast %1 : i32 to vector<8x1xi32>
    %14 = arith.addi %13, %12 : vector<8x1xi32>
    %15 = tpu.iota {dimensions = array<i32: 1>} : vector<8x8xi32>
    %16 = vector.broadcast %14 : vector<8x1xi32> to vector<8x8xi32>
    %17 = arith.cmpi eq, %15, %16 : vector<8x8xi32>
    %cst_6 = arith.constant -1.000000e+00 : f32
    %18 = vector.broadcast %cst_6 : f32 to vector<8x8xf32>
    %19 = arith.select %17, %18, %11 : vector<8x8xi1>, vector<8x8xf32>
    %cst_7 = arith.constant dense<0xFF800000> : vector<8xf32>
    %20 = vector.multi_reduction <maximumf>, %19, %cst_7 [1] : vector<8x8xf32> to vector<8xf32>
    %21 = vector.shape_cast %20 : vector<8xf32> to vector<8x1xf32>
    %cst_8 = arith.constant 2.000000e+00 : f32
    %22 = vector.broadcast %cst_8 : f32 to vector<8x1xf32>
    %23 = arith.mulf %22, %21 : vector<8x1xf32>
    %cst_9 = arith.constant 2.000000e+00 : f32
    %24 = vector.broadcast %cst_9 : f32 to vector<8x1xf32>
    %25 = arith.subf %24, %23 : vector<8x1xf32>
    %cst_10 = arith.constant 0.000000e+00 : f32
    %26 = vector.broadcast %cst_10 : f32 to vector<8x1xf32>
    %27 = arith.maximumf %25, %26 : vector<8x1xf32>
    %28 = math.sqrt %27 : vector<8x1xf32>
    %cst_11 = arith.constant 9.99999993E-9 : f32
    %29 = vector.broadcast %cst_11 : f32 to vector<8x1xf32>
    %30 = arith.addf %28, %29 : vector<8x1xf32>
    %31 = math.log %30 : vector<8x1xf32>
    %32 = vector.shape_cast %31 : vector<8x1xf32> to vector<1x8x1xf32>
    %cst_12 = arith.constant dense<0.000000e+00> : vector<1xf32>
    %33 = vector.multi_reduction <add>, %32, %cst_12 [1, 2] : vector<1x8x1xf32> to vector<1xf32>
    %34 = vector.shape_cast %33 : vector<1xf32> to vector<1x1x1xf32>
    %35 = vector.extract %34[0, 0, 0] : f32 from vector<1x1x1xf32>
    %36 = vector.broadcast %35 : f32 to vector<1x8x128xf32>
    %c0_13 = arith.constant 0 : index
    %c0_14 = arith.constant 0 : index
    %c0_15 = arith.constant 0 : index
    %37 = vector.load %arg5[%c0_13, %c0_14, %c0_15] : memref<1x8x128xf32, #tpu.memory_space<vmem>>, vector<1x8x128xf32>
    tpu.vector_store %arg5[%c0_13, %c0_14, %c0_15], %36 {strides = array<i32>} : memref<1x8x128xf32, #tpu.memory_space<vmem>>, vector<1x8x128xf32>,
    return
  }
  func.func @transform_0(%arg0: i32) -> (i32, i32) {
    %c0_i32 = arith.constant 0 : i32
    %c0_i32_0 = arith.constant 0 : i32
    %c0_i32_1 = arith.constant 0 : i32
    return %c0_i32, %c0_i32_0 : i32, i32
  }
  func.func @transform_1(%arg0: i32) -> (i32, i32) {
    %c0_i32 = arith.constant 0 : i32
    %c0_i32_0 = arith.constant 0 : i32
    return %arg0, %c0_i32 : i32, i32
  }
  func.func @transform_2(%arg0: i32) -> (i32, i32) {
    %c0_i32 = arith.constant 0 : i32
    %c0_i32_0 = arith.constant 0 : i32
    %c0_i32_1 = arith.constant 0 : i32
    return %c0_i32, %c0_i32_0 : i32, i32
  }
  func.func @transform_3(%arg0: i32) -> (i32, i32) {
    %c0_i32 = arith.constant 0 : i32
    %c0_i32_0 = arith.constant 0 : i32
    %c0_i32_1 = arith.constant 0 : i32
    return %c0_i32, %c0_i32_0 : i32, i32
  }
  func.func @transform_4(%arg0: i32) -> (i32, i32, i32) {
    %c0_i32 = arith.constant 0 : i32
    %c0_i32_0 = arith.constant 0 : i32
    %c0_i32_1 = arith.constant 0 : i32
    return %arg0, %c0_i32, %c0_i32_0 : i32, i32, i32
  }
}

</mosaic_0001>

<bundles_post_ra>
// kernel: tpu_custom_call.1
= control target key start
LH: loop header
LB: loop body
LE: loop exit
PB: predicated region body
PF: predicated region fallthrough
CT: control target
= control target key end

     0   :  { %v202_v2 = vmov 0.0   ;;  %vm203_vm0 = vmmov 0   ;;  %s252_s0 = inlined_call_operand.vmem [shape: f32[8,128], index: 0, kind: input, shape index: {}]   ;;  %s253_s1 = inlined_call_operand.vmem [shape: f32[8,1], index: 1, kind: input, shape index: {}]   ;;  %s254_s2 = inlined_call_operand.vmem [shape: f32[1,8], index: 2, kind: input, shape index: {}]   ;;  %s255_s3 = inlined_call_operand.vmem [shape: f32[1,8], index: 3, kind: input, shape index: {}]   ;;  %s256_s4 = inlined_call_operand.hbm [shape: f32[1,8,128], index: 4, kind: output, shape index: {}]  }
   0x1   :  { %v19_v0 = vld [vmem:[%s252_s0] sm:$0xff]  ;;  %162 = vmatprep.subr.mxu0 %v202_v2  ;;  %164 = vmatprep.mubr.msk.f32.mxu0 %vm203_vm0, %v202_v2 }
   0x2   :  { %v92_v1 = vld [vmem:[%s253_s1] sm:$0xff] }
   0x3   :  { %9 = vsyncpa [#allocation3], 0  ;;  %163 = vmatpush3.xpose.msra.mxu0 %v19_v0  ;;  %v204_v3 = vmov 0   ;;  %v107_v4 = vlaneseq  ;;  %v159_v9 = vld [vmem:[%s254_s2] ss:$0 sm:$0xff]  ;;  %vm115_vm2 = vcmask 64512  }
   0x4   :  { %173 = vset.pattern.permute.xlu0 %v204_v3  ;;  %vm132_vm5 = vcmask 7168   ;;  %s205_s1 = smov [#allocation2]  }
   0x5   :  { %95 = vperm.xlu0 %173, %v92_v1   ;;  %v108_v6 = vshrl.u32 %v107_v4, 7  ;;  %v112_v7 = vand.u32 127, %v107_v4  ;;  %s151_s2 = sshll.u32 %s205_s1, 4  ;;  %s152_s2 = int_to_ptr.vmem [resolvable:$true] %s151_s2 }
   0x6   :  { %165 = vmatmul.mubr.f32.vlgmr.msra.gmra.mrb[0].mxu0 %v19_v0  ;;  %s178_s20 = scalar_lea.vmem %s152_s2, 128  ;;  %p183_p1 = scmp.lt.s32.totalorder %s152_s2, %s152_s2 }
   0x7   :  { %vm113_vm1 = vcmp.eq.s32.totalorder %v112_v7, %v108_v6  ;;  %p179_p0 = scmp.ne.s32.totalorder %s152_s2, %s178_s20  ;;  %p184_p2 = scmp.lt.s32.totalorder %s178_s20, %s178_s20 }
   0x9   :  { %p185_p3 = por %p184_p2, %p183_p1 }
   0xb   :  { %p186_p4 = pnand %p185_p3, %p179_p0 }
  0x84   :  { %v96_v5 = vpop.permute.xlu0 %95 }
  0xd9   :  { %v88_v8 = vpop.f32.mrb[0].mxu0 }
  0xda   :  { %v98_v10 = vmul.f32 %v96_v5, %v88_v8  ;;  %v166_v11 = vpop.f32.mrb[1].mxu0 }
  0xdc   :  { %v106_v12 = vmul.f32 %v159_v9, %v98_v10 }
  0xde   :  { %v114_v13 = vsel %vm113_vm1, -1.0, %v106_v12 }
  0xdf   :  { %v116_v14 = vsel %vm115_vm2, %v114_v13, -inf }
  0xe0   :  { %117 = vmax.xlane.f32.xlu0 %v116_v14 }
 0x16d   :  { %v118_v15 = vpop.xlane.xlu0 %117 }
 0x16e   :  { %v119_v16 = vmul.f32 2.0, %v118_v15 }
 0x170   :  { %v120_v17 = vsub.f32 2.0, %v119_v16 }
 0x172   :  { %v121_v18 = vmax.f32 %v120_v17, 0.0 }
 0x174   :  { %174 = vrsqrt.f32 %v121_v18  ;;  %vm124_vm3 = vcmp.eq.f32.partialorder %v121_v18, inf  ;;  %v127_v21 = vand.u32 2147483648, %v121_v18  ;;  %vm126_vm4 = vcmp.eq.f32.partialorder %v121_v18, 0.0 }
 0x17e   :  { %v175_v19 = vpop.eup %174 }
 0x17f   :  { %v123_v20 = vmul.f32 %v175_v19, %v121_v18 }
 0x181   :  { %v125_v22 = vsel %vm124_vm3, %v121_v18, %v123_v20 }
 0x182   :  { %v128_v23 = vsel %vm126_vm4, %v127_v21, %v125_v22 }
 0x183   :  { %v129_v24 = vadd.f32 1e-08, %v128_v23 }
 0x185   :  { %176 = vlog2.f32 %v129_v24 }
 0x18f   :  { %v177_v25 = vpop.eup %176 }
 0x190   :  { %v131_v26 = vmul.f32 0.6931472, %v177_v25 }
 0x192   :  { %v133_v27 = vsel %vm132_vm5, %v131_v26, 0.0 }
 0x193   :  { %134 = vadd.xlane.f32.xlu1 %v133_v27 }
 0x220   :  { %v135_v28 = vpop.xlane.xlu1 %134 }
 0x221   :  { %v136_v29 = vrot.slane %v135_v28, 4 }
 0x223   :  { %v137_v30 = vadd.f32 %v136_v29, %v135_v28 }
 0x225   :  { %v138_v31 = vrot.slane %v137_v30, 2 }
 0x227   :  { %v139_v32 = vadd.f32 %v138_v31, %v137_v30 }
 0x229   :  { %v140_v33 = vrot.slane %v139_v32, 1 }
 0x22b   :  { %v141_v34 = vadd.f32 %v140_v33, %v139_v32 }
 0x22d   :  { %167 = vpush %v141_v34 }
 0x25e   :  { %s168_s19 = spop %167 }
 0x25f   :  { %v143_v35 = vstv %s168_s19 }
 0x260   :  { %144 = vst [vmem:[#allocation2] sm:$0xff] %v143_v35 }
 0x261   :  { %189 = shalt.err (!%p186_p4)
}
 0x262   :  { %s190_s23 = scalar_lea.hbm %s256_s4, 128 }
 0x263   :  { %p191_p5 = scmp.ne.s32.totalorder %s256_s4, %s190_s23  ;;  %p194_p6 = scmp.lt.u32.totalorder %s190_s23, %s256_s4 }
 0x265   :  { %p196_p7 = pnand %p194_p6, %p191_p5 }
 0x267   :  { %199 = shalt.err (!%p196_p7)
}
 0x268   :  { %154 = dma.vmem_to_hbm [thread:$0]  %s152_s2, 128, %s256_s4, [#allocation3]  }
 0x269   :  { %200 = dma.done.wait [#allocation3], 128  }
 0x26a   :  { %201 = vsyncadd [#allocation3], 4294967168 }
 0x26b   :  { %158 = vsyncpa [#allocation3], 1 }

</bundles_post_ra>
